<compile_context>
chip_gen: v7x
topology: tpu7x:2x2x1
jax: 0.10.0
libtpu: 0.0.40
codegen_flags: <defaults>
</compile_context>

<pallas_src>
import functools

import jax
import jax.numpy as jnp
from jax.experimental import pallas as pl
from jax.experimental.pallas import tpu as pltpu

PRELU_ALPHA = 0.25  # torch.nn.PReLU default init


def _round_up(v, m):
    return ((v + m - 1) // m) * m


def _device_kind():
    try:
        return jax.devices()[0].device_kind.lower()
    except Exception:
        return ""


def plan_tiles(num_nodes, *, tm_target=512, tk_target=1024):
    """Tile plan for the (row, contraction) grid over A_norm.

    Tiles are derived from VMEM budget / per-step overhead (not MXU width):
    512x1024 bf16 A blocks ~ 1 MiB -> DMA time well above the ~0.35us fixed
    per-step cost, ~85%+ of HBM roofline.  128-aligned so the pool-matrix
    block (lane dim = tm) and A block (lane dim = tk) stay layout-legal.
    """
    def pick(n, target):
        if n <= target:
            return _round_up(n, 128)
        n_tiles = -(-n // target)            # cdiv
        return _round_up(-(-n // n_tiles), 128)

    tm = pick(num_nodes, tm_target)
    tk = pick(num_nodes, tk_target)
    return {
        "tm": tm,
        "tk": tk,
        "n_pad_r": _round_up(num_nodes, tm),
        "n_pad_c": _round_up(num_nodes, tk),
    }


def _sugbcon_kernel(a_ref, xw_ref, b_ref, p_ref, h_ref, s_ref, *, tk,
                    xw_resident):
    """grid = (i: row tiles of A / H, k: contraction tiles over A's columns).

      a_ref : (tm, tk)              bf16  block (i, k) of A_norm
      xw_ref: (N_pad_c, H_pad) bf16 resident XW   (xw_resident=True)
              (tk, H_pad)      bf16 block (k, 0)  (xw_resident=False)
      b_ref : (1, H_pad)            f32   resident bias
      p_ref : (S_pad, tm)           f32   block (0, i) of the pool matrix
      h_ref : (tm, H_pad)           f32   row tile i of hidden (also the
                                          accumulator: resident across k)
      s_ref : (S_pad, H_pad)        f32   per-row-tile partial summary
    """
    k = pl.program_id(1)

    @pl.when(k == 0)
    def _():
        h_ref[...] = jnp.zeros_like(h_ref)

    if xw_resident:
        start = pl.multiple_of(k * tk, 128)
        xw_blk = xw_ref[pl.ds(start, tk), :]
    else:
        xw_blk = xw_ref[...]

    # bf16 x bf16 on the MXU, f32 accumulation directly in the output block.
    h_ref[...] += jnp.dot(a_ref[...], xw_blk,
                          preferred_element_type=jnp.float32)

    @pl.when(k == pl.num_programs(1) - 1)
    def _():
        # bias + PReLU in f32 (v5e VPU has no bf16).
        h = h_ref[...] + b_ref[...]
        h = jnp.where(h > 0, h, PRELU_ALPHA * h)
        h_ref[...] = h
        # Fused mean-pool: partial summary for this row tile (tiny matmul);
        # summed outside so the row axis can stay (core-)parallel.
        s_ref[...] = jnp.dot(p_ref[...], h, preferred_element_type=jnp.float32)


def sugbcon_pallas(a_norm, x, w, b, pool_mat, *, num_nodes=None, plan=None):
    """Returns (hidden [N, Hd], summary [S, Hd]).

    `a_norm` should ideally already be padded to (n_pad_r, n_pad_c) bf16 (see
    build_norm_adj) so no N^2 pad/cast happens on the hot path.
    """
    N = num_nodes if num_nodes is not None else x.shape[0]
    Hd = w.shape[1]
    S = pool_mat.shape[0]

    if plan is None:
        plan = plan_tiles(N)
    tm, tk = plan["tm"], plan["tk"]
    n_pad_r, n_pad_c = plan["n_pad_r"], plan["n_pad_c"]
    H_pad = _round_up(Hd, 128)
    S_pad = _round_up(S, 8)
    n_i = n_pad_r // tm
    n_k = n_pad_c // tk

    # --- A: expect pre-padded bf16; slow fallback pads/casts here. ---
    if a_norm.shape == (n_pad_r, n_pad_c) and a_norm.dtype == jnp.bfloat16:
        a_p = a_norm
    else:
        a_p = jnp.zeros((n_pad_r, n_pad_c), jnp.bfloat16).at[:N, :N].set(
            a_norm[:N, :N].astype(jnp.bfloat16))

    # --- XW precompute (tiny: N x F_in x Hd) -> bf16 streamed operand. ---
    xw = x[:N].astype(jnp.float32) @ w.astype(jnp.float32)
    xw_p = jnp.zeros((n_pad_c, H_pad), jnp.bfloat16).at[:N, :Hd].set(
        xw.astype(jnp.bfloat16))

    # Small resident operands stay f32 (bias / PReLU / pool precision).
    b_p = jnp.zeros((1, H_pad), jnp.float32).at[:, :Hd].set(
        jnp.reshape(b, (1, Hd)).astype(jnp.float32))
    p_p = jnp.zeros((S_pad, n_pad_r), jnp.float32).at[:S, :N].set(
        pool_mat.astype(jnp.float32))

    # --- Per-generation VMEM plan. ---
    kind = _device_kind()
    is_v7x = "v7" in kind
    vmem_limit = (48 if is_v7x else 64) * 1024 * 1024  # v7x: 64 MiB/TC physical

    fixed_vmem = (2 * tm * tk * 2          # A double buffer (bf16)
                  + 2 * tm * H_pad * 4     # hidden out block (f32)
                  + 2 * S_pad * H_pad * 4  # partial summary out block
                  + 2 * S_pad * tm * 4     # pool block
                  + 2 * H_pad * 4)         # bias
    xw_bytes = 2 * n_pad_c * H_pad * 2     # conservatively assume 2 buffers
    xw_resident = (fixed_vmem + xw_bytes) <= (vmem_limit - (8 << 20))

    if xw_resident:
        xw_spec = pl.BlockSpec((n_pad_c, H_pad), lambda i, k: (0, 0))
        xw_stream_bytes = xw_p.size * 2
    else:
        xw_spec = pl.BlockSpec((tk, H_pad), lambda i, k: (k, 0))
        xw_stream_bytes = xw_p.size * 2 * n_i

    # --- Megacore: shard row tiles across the 2 TensorCores on v7x. ---
    if is_v7x and n_i >= 2 and n_i % 2 == 0:
        dims = (pltpu.CORE_PARALLEL, pltpu.ARBITRARY)
    else:
        dims = ("parallel", "arbitrary")

    flops = 2 * n_pad_r * n_pad_c * H_pad + 2 * n_i * S_pad * tm * H_pad
    bytes_accessed = (a_p.size * 2 + xw_stream_bytes + b_p.size * 4
                      + p_p.size * 4 + n_pad_r * H_pad * 4
                      + n_i * S_pad * H_pad * 4)

    kernel = functools.partial(_sugbcon_kernel, tk=tk, xw_resident=xw_resident)

    hidden_p, s_part = pl.pallas_call(
        kernel,
        out_shape=(
            jax.ShapeDtypeStruct((n_pad_r, H_pad), jnp.float32),
            jax.ShapeDtypeStruct((n_i, S_pad, H_pad), jnp.float32),
        ),
        grid_spec=pltpu.PrefetchScalarGridSpec(
            num_scalar_prefetch=0,
            grid=(n_i, n_k),
            in_specs=[
                pl.BlockSpec((tm, tk), lambda i, k: (i, k)),        # A_norm
                xw_spec,                                            # X @ W
                pl.BlockSpec((1, H_pad), lambda i, k: (0, 0)),      # bias
                pl.BlockSpec((S_pad, tm), lambda i, k: (0, i)),     # pool mat
            ],
            out_specs=(
                pl.BlockSpec((tm, H_pad), lambda i, k: (i, 0)),
                pl.BlockSpec((None, S_pad, H_pad), lambda i, k: (i, 0, 0)),
            ),
        ),
        compiler_params=pltpu.CompilerParams(
            dimension_semantics=dims,
            vmem_limit_bytes=vmem_limit,
        ),
        cost_estimate=pl.CostEstimate(
            flops=flops, transcendentals=0, bytes_accessed=bytes_accessed),
    )(a_p, xw_p, b_p, p_p)

    hidden = hidden_p[:N, :Hd]
    summary = s_part.sum(axis=0)[:S, :Hd]
    return hidden, summary


def sugbcon_forward(x, a_norm, pool_mat, w, b, index=None, *, num_nodes=None,
                    plan=None):
    """Mirror of SugbCon.forward: returns hidden, or (z, summary)."""
    hidden, summary = sugbcon_pallas(a_norm, x, w, b, pool_mat,
                                     num_nodes=num_nodes, plan=plan)
    if index is None:
        return hidden
    z = hidden[index]  # glue: gather of center-node embeddings
    return z, summary


def build_norm_adj(edge_index, num_nodes, *, pad_rows=None, pad_cols=None,
                   dtype=jnp.bfloat16):
    """Dense GCN-normalized adjacency with self loops: D^-1/2 (A+I) D^-1/2.

    Emitted already padded to (pad_rows, pad_cols) and cast to the streaming
    dtype so the per-call wrapper does no N^2 pad/cast traffic.

    Note: duplicate / self-loop edges in edge_index are deduplicated before
    adding I (minor deviation from GCNConv's add_self_loops); not kernel math.
    """
    src, dst = edge_index
    adj = jnp.zeros((num_nodes, num_nodes), jnp.float32)
    adj = adj.at[src, dst].set(1.0)
    adj = adj.at[dst, src].set(1.0)          # undirected
    adj = adj + jnp.eye(num_nodes, dtype=jnp.float32)
    deg = adj.sum(axis=1)
    dinv = 1.0 / jnp.sqrt(jnp.maximum(deg, 1.0))
    a = adj * dinv[:, None] * dinv[None, :]
    pr = pad_rows if pad_rows is not None else num_nodes
    pc = pad_cols if pad_cols is not None else num_nodes
    if (pr, pc) != (num_nodes, num_nodes) or dtype != jnp.float32:
        a = jnp.zeros((pr, pc), dtype).at[:num_nodes, :num_nodes].set(
            a.astype(dtype))
    return a


def build_pool_matrix(batch, num_subgraphs, num_nodes):
    """Row-normalized one-hot assignment: P[s, n] = (batch[n]==s)/|s|."""
    onehot = (batch[None, :] == jnp.arange(num_subgraphs)[:, None]).astype(
        jnp.float32)
    counts = jnp.maximum(onehot.sum(axis=1, keepdims=True), 1.0)
    return onehot / counts


if __name__ == "__main__":
    # Small deterministic problem: N nodes, F_in input feats, hidden dim Hd,
    # S subgraphs (one center node sampled per subgraph -> `index`).
    N, F_in, Hd, S = 64, 16, 32, 8

    key = jax.random.PRNGKey(0)
    kx, ke, kw = jax.random.split(key, 3)

    # node features
    x = jax.random.normal(kx, (N, F_in), dtype=jnp.float32)

    # random undirected edges -> dense normalized adjacency, built already
    # padded + bf16 (pad/cast hoisted out of the per-call hot path).
    num_edges = 128
    edge_index = jax.random.randint(ke, (2, num_edges), 0, N, dtype=jnp.int32)
    plan = plan_tiles(N)
    a_pad = build_norm_adj(edge_index, N, pad_rows=plan["n_pad_r"],
                           pad_cols=plan["n_pad_c"], dtype=jnp.bfloat16)

    # subgraph assignment (batch) + one center node per subgraph (index)
    batch = jnp.arange(N, dtype=jnp.int32) % S
    pool_mat = build_pool_matrix(batch, S, N)
    index = jnp.arange(S, dtype=jnp.int32) * (N // S)

    # encoder parameters (GCNConv): glorot-uniform W, zero bias
    limit = (6.0 / (F_in + Hd)) ** 0.5
    w = jax.random.uniform(kw, (F_in, Hd), jnp.float32, -limit, limit)
    b = jnp.zeros((1, Hd), jnp.float32)

    # TODO(synk): scorer / SupConLoss / MarginRankingLoss / test() are not part
    # of forward(); only the forward-pass semantics are implemented here.

    # index=None branch -> returns hidden
    hidden = sugbcon_forward(x, a_pad, pool_mat, w, b, index=None,
                             num_nodes=N, plan=plan)
    # index given -> returns (z, summary)
    z, summary = sugbcon_forward(x, a_pad, pool_mat, w, b, index=index,
                                 num_nodes=N, plan=plan)

    jax.block_until_ready((hidden, z, summary))

    # sanity check vs a plain-JAX reference on the same bf16-quantized streamed
    # operands (A and XW are bf16; bias / PReLU / pool stay f32, like kernel).
    a_q = a_pad[:N, :N].astype(jnp.float32)
    xw_q = (x @ w).astype(jnp.bfloat16).astype(jnp.float32)
    h_ref = a_q @ xw_q + b
    h_ref = jnp.where(h_ref > 0, h_ref, PRELU_ALPHA * h_ref)
    s_ref = pool_mat @ h_ref
    assert jnp.allclose(hidden, h_ref, atol=1e-2, rtol=1e-2)
    assert jnp.allclose(z, h_ref[index], atol=1e-2, rtol=1e-2)
    assert jnp.allclose(summary, s_ref, atol=1e-2, rtol=1e-2)
    assert hidden.shape == (N, Hd) and z.shape == (S, Hd) and summary.shape == (S, Hd)

    print("KERNEL_OK")
</pallas_src>

<mosaic_0001>
module attributes {stable_mosaic.version = 11 : i64} {
  func.func @_sugbcon_kernel(%arg0: i32, %arg1: i32, %arg2: memref<128x128xbf16, #tpu.memory_space<vmem>>, %arg3: memref<128x128xbf16, #tpu.memory_space<vmem>>, %arg4: memref<1x128xf32, #tpu.memory_space<vmem>>, %arg5: memref<8x128xf32, #tpu.memory_space<vmem>>, %arg6: memref<128x128xf32, #tpu.memory_space<vmem>>, %arg7: memref<1x8x128xf32, #tpu.memory_space<vmem>>) attributes {dimension_semantics = [#tpu.dimension_semantics<parallel>, #tpu.dimension_semantics<arbitrary>], iteration_bounds = array<i64: 1, 1>, scalar_prefetch = 0 : i64, scratch_operands = 0 : i64, tpu.core_type = #tpu.core_type<tc>, window_params = [{transform_indices = @transform_0, window_bounds = array<i64: 128, 128>}, {pipeline_mode = #tpu.pipeline_mode<synchronous>, transform_indices = @transform_1, window_bounds = array<i64: 128, 128>}, {pipeline_mode = #tpu.pipeline_mode<synchronous>, transform_indices = @transform_2, window_bounds = array<i64: 1, 128>}, {transform_indices = @transform_3, window_bounds = array<i64: 8, 128>}, {transform_indices = @transform_4, window_bounds = array<i64: 128, 128>}, {transform_indices = @transform_5, window_bounds = array<i64: 1, 8, 128>}]} {
    %c0_i32 = arith.constant 0 : i32
    %0 = arith.cmpi eq, %arg1, %c0_i32 : i32
    %1 = arith.extui %0 : i1 to i32
    %c0_i32_0 = arith.constant 0 : i32
    %2 = arith.cmpi ne, %1, %c0_i32_0 : i32
    scf.if %2 {
      %cst_9 = arith.constant 0.000000e+00 : f32
      %15 = vector.broadcast %cst_9 : f32 to vector<128x128xf32>
      %c0_10 = arith.constant 0 : index
      %c0_11 = arith.constant 0 : index
      %16 = vector.load %arg6[%c0_10, %c0_11] : memref<128x128xf32, #tpu.memory_space<vmem>>, vector<128x128xf32>
      tpu.vector_store %arg6[%c0_10, %c0_11], %15 {strides = array<i32>} : memref<128x128xf32, #tpu.memory_space<vmem>>, vector<128x128xf32>,
    } else {
    }
    %c128_i32 = arith.constant 128 : i32
    %3 = arith.muli %arg1, %c128_i32 : i32
    %4 = tpu.assume_multiple %3, 128 : i32
    %5 = arith.index_cast %4 : i32 to index
    %c0 = arith.constant 0 : index
    %6 = vector.load %arg3[%5, %c0] : memref<128x128xbf16, #tpu.memory_space<vmem>>, vector<128x128xbf16>
    %c0_1 = arith.constant 0 : index
    %c0_2 = arith.constant 0 : index
    %7 = vector.load %arg6[%c0_1, %c0_2] : memref<128x128xf32, #tpu.memory_space<vmem>>, vector<128x128xf32>
    %c0_3 = arith.constant 0 : index
    %c0_4 = arith.constant 0 : index
    %8 = vector.load %arg2[%c0_3, %c0_4] : memref<128x128xbf16, #tpu.memory_space<vmem>>, vector<128x128xbf16>
    %cst = arith.constant dense<0.000000e+00> : vector<128x128xf32>
    %9 = tpu.matmul %8, %6, %cst {dimension_numbers = #tpu.dot_dimension_numbers<[1], [0], [0], [1], [0, 0, 1, 1], [], []>} : vector<128x128xbf16>, vector<128x128xbf16>, vector<128x128xf32> -> vector<128x128xf32>
    %10 = arith.addf %7, %9 : vector<128x128xf32>
    %c0_5 = arith.constant 0 : index
    %c0_6 = arith.constant 0 : index
    %11 = vector.load %arg6[%c0_5, %c0_6] : memref<128x128xf32, #tpu.memory_space<vmem>>, vector<128x128xf32>
    tpu.vector_store %arg6[%c0_5, %c0_6], %10 {strides = array<i32>} : memref<128x128xf32, #tpu.memory_space<vmem>>, vector<128x128xf32>,
    %c0_i32_7 = arith.constant 0 : i32
    %12 = arith.cmpi eq, %arg1, %c0_i32_7 : i32
    %13 = arith.extui %12 : i1 to i32
    %c0_i32_8 = arith.constant 0 : i32
    %14 = arith.cmpi ne, %13, %c0_i32_8 : i32
    scf.if %14 {
      %c0_9 = arith.constant 0 : index
      %c0_10 = arith.constant 0 : index
      %15 = vector.load %arg6[%c0_9, %c0_10] : memref<128x128xf32, #tpu.memory_space<vmem>>, vector<128x128xf32>
      %c0_11 = arith.constant 0 : index
      %c0_12 = arith.constant 0 : index
      %16 = vector.load %arg4[%c0_11, %c0_12] : memref<1x128xf32, #tpu.memory_space<vmem>>, vector<1x128xf32>
      %17 = vector.broadcast %16 : vector<1x128xf32> to vector<128x128xf32>
      %18 = arith.addf %15, %17 : vector<128x128xf32>
      %cst_13 = arith.constant 0.000000e+00 : f32
      %19 = vector.broadcast %cst_13 : f32 to vector<128x128xf32>
      %20 = arith.cmpf ogt, %18, %19 : vector<128x128xf32>
      %cst_14 = arith.constant 2.500000e-01 : f32
      %21 = vector.broadcast %cst_14 : f32 to vector<128x128xf32>
      %22 = arith.mulf %21, %18 : vector<128x128xf32>
      %23 = arith.select %20, %18, %22 : vector<128x128xi1>, vector<128x128xf32>
      %c0_15 = arith.constant 0 : index
      %c0_16 = arith.constant 0 : index
      %24 = vector.load %arg6[%c0_15, %c0_16] : memref<128x128xf32, #tpu.memory_space<vmem>>, vector<128x128xf32>
      tpu.vector_store %arg6[%c0_15, %c0_16], %23 {strides = array<i32>} : memref<128x128xf32, #tpu.memory_space<vmem>>, vector<128x128xf32>,
      %c0_17 = arith.constant 0 : index
      %c0_18 = arith.constant 0 : index
      %25 = vector.load %arg5[%c0_17, %c0_18] : memref<8x128xf32, #tpu.memory_space<vmem>>, vector<8x128xf32>
      %cst_19 = arith.constant dense<0.000000e+00> : vector<8x128xf32>
      %26 = tpu.matmul %25, %23, %cst_19 {dimension_numbers = #tpu.dot_dimension_numbers<[1], [0], [0], [1], [0, 0, 1, 1], [], []>} : vector<8x128xf32>, vector<128x128xf32>, vector<8x128xf32> -> vector<8x128xf32>
      %c0_20 = arith.constant 0 : index
      %c0_21 = arith.constant 0 : index
      %c0_22 = arith.constant 0 : index
      %27 = vector.load %arg7[%c0_20, %c0_21, %c0_22] : memref<1x8x128xf32, #tpu.memory_space<vmem>>, vector<1x8x128xf32>
      %28 = vector.shape_cast %27 : vector<1x8x128xf32> to vector<8x128xf32>
      %29 = vector.shape_cast %26 : vector<8x128xf32> to vector<1x8x128xf32>
      tpu.vector_store %arg7[%c0_20, %c0_21, %c0_22], %29 {strides = array<i32>} : memref<1x8x128xf32, #tpu.memory_space<vmem>>, vector<1x8x128xf32>,
    } else {
    }
    return
  }
  func.func @transform_0(%arg0: i32, %arg1: i32) -> (i32, i32) {
    %c0_i32 = arith.constant 0 : i32
    return %arg0, %arg1 : i32, i32
  }
  func.func @transform_1(%arg0: i32, %arg1: i32) -> (i32, i32) {
    %c0_i32 = arith.constant 0 : i32
    %c0_i32_0 = arith.constant 0 : i32
    %c0_i32_1 = arith.constant 0 : i32
    return %c0_i32, %c0_i32_0 : i32, i32
  }
  func.func @transform_2(%arg0: i32, %arg1: i32) -> (i32, i32) {
    %c0_i32 = arith.constant 0 : i32
    %c0_i32_0 = arith.constant 0 : i32
    %c0_i32_1 = arith.constant 0 : i32
    return %c0_i32, %c0_i32_0 : i32, i32
  }
  func.func @transform_3(%arg0: i32, %arg1: i32) -> (i32, i32) {
    %c0_i32 = arith.constant 0 : i32
    %c0_i32_0 = arith.constant 0 : i32
    return %c0_i32, %arg0 : i32, i32
  }
  func.func @transform_4(%arg0: i32, %arg1: i32) -> (i32, i32) {
    %c0_i32 = arith.constant 0 : i32
    %c0_i32_0 = arith.constant 0 : i32
    return %arg0, %c0_i32 : i32, i32
  }
  func.func @transform_5(%arg0: i32, %arg1: i32) -> (i32, i32, i32) {
    %c0_i32 = arith.constant 0 : i32
    %c0_i32_0 = arith.constant 0 : i32
    %c0_i32_1 = arith.constant 0 : i32
    return %arg0, %c0_i32, %c0_i32_0 : i32, i32, i32
  }
}

</mosaic_0001>

<bundles_post_ra>
// kernel: tpu_custom_call.1
= control target key start
LH: loop header
LB: loop body
LE: loop exit
PB: predicated region body
PF: predicated region fallthrough
CT: control target
= control target key end

     0   :  { %11 = vsyncpa [#allocation3], 0  ;;  %s1044_s0 = inlined_call_operand.hbm [shape: bf16[128,128], index: 0, kind: input, shape index: {}]   ;;  %s1045_s1 = inlined_call_operand.hbm [shape: bf16[128,128], index: 1, kind: input, shape index: {}]   ;;  %s1046_s2 = inlined_call_operand.hbm [shape: f32[1,128], index: 2, kind: input, shape index: {}]   ;;  %s1047_s3 = inlined_call_operand.hbm [shape: f32[8,128], index: 3, kind: input, shape index: {}]   ;;  %s1048_s4 = inlined_call_operand.hbm [shape: f32[128,128], index: 4, kind: output, shape index: {0}]   ;;  %s1049_s5 = inlined_call_operand.hbm [shape: f32[1,8,128], index: 5, kind: output, shape index: {1}]  }
   0x1   :  { %12 = vsyncpa [#allocation6], 0 }
   0x2   :  { %13 = vsyncpa [#allocation9], 0 }
   0x3   :  { %14 = vsyncpa [#allocation4], 0 }
   0x4   :  { %15 = vsyncpa [#allocation12], 0  ;;  %s896_s18 = smov [#allocation5]   ;;  %s897_s20 = smov [#allocation2]  }
   0x5   :  { %s33_s19 = sshll.u32 %s896_s18, 4  ;;  %s21_s21 = sshll.u32 %s897_s20, 4  ;;  %s34_s19 = int_to_ptr.vmem [resolvable:$true] %s33_s19  ;;  %s939_s21 = int_to_ptr.vmem [resolvable:$true] %s21_s21 }
   0x6   :  { %s754_s24 = scalar_lea.hbm %s1045_s1, 1024 }
   0x7   :  { %p755_p0 = scmp.ne.s32.totalorder %s1045_s1, %s754_s24  ;;  %p758_p1 = scmp.lt.u32.totalorder %s754_s24, %s1045_s1 }
   0x9   :  { %p760_p2 = pnand %p758_p1, %p755_p0 }
   0xb   :  { %763 = shalt.err (!%p760_p2)
}
   0xc   :  { %s764_s29 = scalar_lea.vmem %s34_s19, 1024  ;;  %p769_p4 = scmp.lt.s32.totalorder %s34_s19, %s34_s19 }
   0xd   :  { %p765_p3 = scmp.ne.s32.totalorder %s34_s19, %s764_s29  ;;  %p770_p5 = scmp.lt.s32.totalorder %s764_s29, %s764_s29 }
   0xf   :  { %p771_p6 = por %p770_p5, %p769_p4 }
  0x11   :  { %p772_p7 = pnand %p771_p6, %p765_p3 }
  0x13   :  { %775 = shalt.err (!%p772_p7)
}
  0x14   :  { %s898_s30 = smov 64   ;;  %s899_s6 = smov 4  }
  0x15   :  { %39 = dma.hbm_to_vmem [thread:$0]  %s1045_s1, 1024, %s34_s19, [#allocation6], %s898_s30, %s898_s30, %s899_s6  }
  0x16   :  { %s776_s11 = scalar_lea.hbm %s1044_s0, 1024 }
  0x17   :  { %p777_p8 = scmp.ne.s32.totalorder %s1044_s0, %s776_s11  ;;  %p780_p9 = scmp.lt.u32.totalorder %s776_s11, %s1044_s0 }
  0x19   :  { %p782_p10 = pnand %p780_p9, %p777_p8 }
  0x1b   :  { %785 = shalt.err (!%p782_p10)
}
  0x1c   :  { %s786_s16 = scalar_lea.vmem %s939_s21, 1024  ;;  %p791_p12 = scmp.lt.s32.totalorder %s939_s21, %s939_s21 }
  0x1d   :  { %p787_p11 = scmp.ne.s32.totalorder %s939_s21, %s786_s16  ;;  %p792_p13 = scmp.lt.s32.totalorder %s786_s16, %s786_s16 }
  0x1f   :  { %p793_p0 = por %p792_p13, %p791_p12 }
  0x21   :  { %p794_p1 = pnand %p793_p0, %p787_p11 }
  0x23   :  { %797 = shalt.err (!%p794_p1)
}
  0x24   :  { %27 = dma.hbm_to_vmem [thread:$0]  %s1044_s0, 1024, %s939_s21, [#allocation3], %s898_s30, %s898_s30, %s899_s6  }
  0x25   :  { %s900_s18 = smov [#allocation7]   ;;  %s901_s20 = smov [#allocation8]  }
  0x26   :  { %s46_s19 = sshll.u32 %s900_s18, 4  ;;  %s56_s22 = sshll.u32 %s901_s20, 4  ;;  %s47_s19 = int_to_ptr.vmem [resolvable:$true] %s46_s19  ;;  %s57_s22 = int_to_ptr.vmem [resolvable:$true] %s56_s22 }
  0x27   :  { %s798_s25 = scalar_lea.hbm %s1046_s2, 16 }
  0x28   :  { %p799_p2 = scmp.ne.s32.totalorder %s1046_s2, %s798_s25  ;;  %p802_p3 = scmp.lt.u32.totalorder %s798_s25, %s1046_s2 }
  0x2a   :  { %p804_p4 = pnand %p802_p3, %p799_p2 }
  0x2c   :  { %807 = shalt.err (!%p804_p4)
}
  0x2d   :  { %s808_s0 = scalar_lea.vmem %s47_s19, 16  ;;  %s812_s21 = scalar_lea.vmem %s47_s19, 32 }
  0x2e   :  { %p809_p5 = scmp.ne.s32.totalorder %s47_s19, %s808_s0  ;;  %p813_p6 = scmp.lt.s32.totalorder %s47_s19, %s47_s19 }
  0x2f   :  { %p814_p7 = scmp.lt.s32.totalorder %s812_s21, %s808_s0 }
  0x31   :  { %p815_p8 = por %p814_p7, %p813_p6 }
  0x33   :  { %p816_p9 = pnand %p815_p8, %p809_p5 }
  0x35   :  { %819 = shalt.err (!%p816_p9)
}
  0x36   :  { %49 = dma.hbm_to_vmem [thread:$0]  %s1046_s2, 16, %s47_s19, [#allocation6]  }
  0x37   :  { %s820_s9 = scalar_lea.hbm %s1047_s3, 128 }
  0x38   :  { %p821_p10 = scmp.ne.s32.totalorder %s1047_s3, %s820_s9  ;;  %p824_p11 = scmp.lt.u32.totalorder %s820_s9, %s1047_s3 }
  0x3a   :  { %p826_p12 = pnand %p824_p11, %p821_p10 }
  0x3c   :  { %829 = shalt.err (!%p826_p12)
}
  0x3d   :  { %s830_s14 = scalar_lea.vmem %s57_s22, 128  ;;  %p835_p0 = scmp.lt.s32.totalorder %s57_s22, %s57_s22 }
  0x3e   :  { %p831_p13 = scmp.ne.s32.totalorder %s57_s22, %s830_s14  ;;  %p836_p1 = scmp.lt.s32.totalorder %s830_s14, %s830_s14 }
  0x40   :  { %p837_p2 = por %p836_p1, %p835_p0 }
  0x42   :  { %p838_p3 = pnand %p837_p2, %p831_p13 }
  0x44   :  { %841 = shalt.err (!%p838_p3)
}
  0x45   :  { %59 = dma.hbm_to_vmem [thread:$0]  %s1047_s3, 128, %s57_s22, [#allocation9]  }
  0x46   :  { %886 = dma.done.wait [#allocation3], 1024  }
  0x47   :  { %887 = vsyncadd [#allocation3], 4294966272 }
  0x48   :  { %888 = dma.done.wait [#allocation6], 1040  }
  0x49   :  { %889 = vsyncadd [#allocation6], 4294966256 }
  0x4a   :  { %890 = dma.done.wait [#allocation9], 128  }
  0x4b   :  { %891 = vsyncadd [#allocation9], 4294967168  ;;  %v738_v0 = vld [vmem:[#allocation5] sm:$0xff]   ;;  %v739_v1 = vld [vmem:[#allocation5 + $0x8] sm:$0xff]   ;;  %v902_v16 = vmov 0.0|0.0   ;;  %vm903_vm0 = vmmov 0  }
  0x4c   :  { %634 = vmatprep.subr.bf16.mxu0 %v738_v0  ;;  %v740_v2 = vld [vmem:[#allocation5 + $0x10] sm:$0xff]   ;;  %v741_v3 = vld [vmem:[#allocation5 + $0x18] sm:$0xff]   ;;  %v746_v4 = vld [vmem:[#allocation2] sm:$0xff]   ;;  %701 = vmatprep.subr.bf16.mxu1 %v902_v16  ;;  %v904_v17 = vmov 0.0   ;;  %s905_s3 = smov [#allocation10]  }
  0x4d   :  { %635 = vmatpush3.bf16.msra.mxu0 %v738_v0  ;;  %650 = vmatprep.mubr.bf16.mxu0 %v746_v4  ;;  %v742_v5 = vld [vmem:[#allocation5 + $0x20] sm:$0xff]   ;;  %v743_v6 = vld [vmem:[#allocation5 + $0x28] sm:$0xff]   ;;  %v744_v7 = vld [vmem:[#allocation5 + $0x30] sm:$0xff]   ;;  %s554_s16 = sshll.u32 %s905_s3, 4  ;;  %s555_s16 = int_to_ptr.vmem [resolvable:$true] %s554_s16 }
  0x4e   :  { %636 = vmatprep.subr.bf16.mxu0 %v739_v1  ;;  %v745_v8 = vld [vmem:[#allocation5 + $0x38] sm:$0xff]   ;;  %v747_v9 = vld [vmem:[#allocation2 + $0x8] sm:$0xff]   ;;  %v748_v10 = vld [vmem:[#allocation2 + $0x10] sm:$0xff]   ;;  %698 = vmatprep.mubr.msk.f32.mxu1 %vm903_vm0, %v904_v17  ;;  %s842_s1 = scalar_lea.vmem %s555_s16, 2048  ;;  %p847_p5 = scmp.lt.s32.totalorder %s555_s16, %s555_s16 }
  0x4f   :  { %v749_v11 = vld [vmem:[#allocation2 + $0x18] sm:$0xff]   ;;  %v750_v12 = vld [vmem:[#allocation2 + $0x20] sm:$0xff]   ;;  %v751_v13 = vld [vmem:[#allocation2 + $0x28] sm:$0xff]   ;;  %p843_p4 = scmp.ne.s32.totalorder %s555_s16, %s842_s1  ;;  %p848_p6 = scmp.lt.s32.totalorder %s842_s1, %s842_s1 }
  0x50   :  { %v752_v14 = vld [vmem:[#allocation2 + $0x30] sm:$0xff]   ;;  %v753_v15 = vld [vmem:[#allocation2 + $0x38] sm:$0xff]   ;;  %v995_v19 = vld [vmem:[#allocation7] ss:$0 sm:$0xff] }
  0x51   :  { %637 = vmatpush3.bf16.msra.mxu0 %v739_v1  ;;  %p849_p7 = por %p848_p6, %p847_p5 }
  0x52   :  { %638 = vmatprep.subr.bf16.mxu0 %v740_v2 }
  0x53   :  { %p850_p8 = pnand %p849_p7, %p843_p4 }
  0x55   :  { %639 = vmatpush3.bf16.msra.mxu0 %v740_v2 }
  0x56   :  { %640 = vmatprep.subr.bf16.mxu0 %v741_v3 }
  0x59   :  { %641 = vmatpush3.bf16.msra.mxu0 %v741_v3 }
  0x5a   :  { %642 = vmatprep.subr.bf16.mxu0 %v742_v5 }
  0x5d   :  { %643 = vmatpush3.bf16.msra.mxu0 %v742_v5 }
  0x5e   :  { %644 = vmatprep.subr.bf16.mxu0 %v743_v6 }
  0x61   :  { %645 = vmatpush3.bf16.msra.mxu0 %v743_v6 }
  0x62   :  { %646 = vmatprep.subr.bf16.mxu0 %v744_v7 }
  0x65   :  { %647 = vmatpush3.bf16.msra.mxu0 %v744_v7 }
  0x66   :  { %648 = vmatprep.subr.bf16.mxu0 %v745_v8 }
  0x69   :  { %649 = vmatpush3.bf16.msra.mxu0 %v745_v8 }
  0x6c   :  { %651 = vmatmul.mubr.bf16.vlgmr.msra.gmra.mrb[0].mxu0 %v747_v9 }
  0x6d   :  { %654 = vmatprep.mubr.bf16.mxu0 %v748_v10 }
  0x74   :  { %655 = vmatmul.mubr.bf16.gmra.mrb[4].mxu0 %v749_v11 }
  0x75   :  { %658 = vmatprep.mubr.bf16.mxu0 %v750_v12 }
  0x7c   :  { %659 = vmatmul.mubr.bf16.gmra.mrb[8].mxu0 %v751_v13 }
  0x7d   :  { %662 = vmatprep.mubr.bf16.mxu0 %v752_v14 }
  0x84   :  { %663 = vmatmul.mubr.bf16.gmra.mrb[12].mxu0 %v753_v15 }
 0x13f   :  { %v652_v18 = vpop.f32.mrb[0].mxu0 }
 0x140   :  { %v276_v20 = vpop.f32.mrb[1].mxu0  ;;  %v399_v23 = vadd.f32 %v652_v18, %v995_v19 }
 0x141   :  { %v653_v21 = vpop.f32.mrb[2].mxu0  ;;  %v397_v24 = vadd.f32 %v995_v19, %v276_v20 }
 0x142   :  { %v279_v22 = vpop.f32.mrb[3].mxu0  ;;  %v400_v25 = vadd.f32 %v653_v21, %v995_v19  ;;  %vm415_vm1 = vcmp.gt.f32.partialorder %v399_v23, 0.0  ;;  %v431_v26 = vmul.f32 0.25, %v399_v23 }
 0x143   :  { %v398_v27 = vadd.f32 %v995_v19, %v279_v22  ;;  %vm413_vm2 = vcmp.gt.f32.partialorder %v397_v24, 0.0  ;;  %v429_v28 = vmul.f32 0.25, %v397_v24 }
 0x144   :  { %vm416_vm3 = vcmp.gt.f32.partialorder %v400_v25, 0.0  ;;  %v432_v29 = vmul.f32 0.25, %v400_v25  ;;  %v447_v30 = vsel %vm415_vm1, %v399_v23, %v431_v26 }
 0x145   :  { %vm414_vm4 = vcmp.gt.f32.partialorder %v398_v27, 0.0  ;;  %v430_v32 = vmul.f32 0.25, %v398_v27  ;;  %v445_v33 = vsel %vm413_vm2, %v397_v24, %v429_v28  ;;  %463 = vst [vmem:[#allocation10 + $0x10] sm:$0xff] %v447_v30 }
 0x146   :  { %461 = vst [vmem:[#allocation10] sm:$0xff] %v445_v33  ;;  %v448_v35 = vsel %vm416_vm3, %v400_v25, %v432_v29 }
 0x147   :  { %v656_v31 = vpop.f32.mrb[4].mxu0  ;;  %v446_v37 = vsel %vm414_vm4, %v398_v27, %v430_v32  ;;  %464 = vst [vmem:[#allocation10 + $0x18] sm:$0xff] %v448_v35  ;;  %v705_v38 = vpack.c.bf16 %v448_v35, %v447_v30 }
 0x148   :  { %v292_v34 = vpop.f32.mrb[5].mxu0  ;;  %462 = vst [vmem:[#allocation10 + $0x8] sm:$0xff] %v446_v37  ;;  %v702_v40 = vpack.c.bf16 %v446_v37, %v445_v33  ;;  %v403_v41 = vadd.f32 %v656_v31, %v995_v19 }
 0x149   :  { %v657_v36 = vpop.f32.mrb[6].mxu0  ;;  %v401_v42 = vadd.f32 %v995_v19, %v292_v34 }
 0x14a   :  { %v295_v39 = vpop.f32.mrb[7].mxu0  ;;  %703 = vmatpush3.bf16.msra.mxu1 %v702_v40  ;;  %v404_v43 = vadd.f32 %v657_v36, %v995_v19  ;;  %vm419_vm5 = vcmp.gt.f32.partialorder %v403_v41, 0.0  ;;  %v435_v44 = vmul.f32 0.25, %v403_v41 }
 0x14b   :  { %704 = vmatprep.subr.bf16.mxu1 %v902_v16  ;;  %v402_v45 = vadd.f32 %v995_v19, %v295_v39  ;;  %vm417_vm6 = vcmp.gt.f32.partialorder %v401_v42, 0.0  ;;  %v433_v46 = vmul.f32 0.25, %v401_v42 }
 0x14c   :  { %vm420_vm7 = vcmp.gt.f32.partialorder %v404_v43, 0.0  ;;  %v436_v47 = vmul.f32 0.25, %v404_v43  ;;  %v451_v48 = vsel %vm419_vm5, %v403_v41, %v435_v44 }
 0x14d   :  { %vm418_vm8 = vcmp.gt.f32.partialorder %v402_v45, 0.0  ;;  %v434_v50 = vmul.f32 0.25, %v402_v45  ;;  %v449_v51 = vsel %vm417_vm6, %v401_v42, %v433_v46  ;;  %467 = vst [vmem:[#allocation10 + $0x30] sm:$0xff] %v451_v48 }
 0x14e   :  { %706 = vmatpush3.bf16.msra.mxu1 %v705_v38  ;;  %465 = vst [vmem:[#allocation10 + $0x20] sm:$0xff] %v449_v51  ;;  %v452_v53 = vsel %vm420_vm7, %v404_v43, %v436_v47 }
 0x14f   :  { %v660_v49 = vpop.f32.mrb[8].mxu0  ;;  %707 = vmatprep.subr.bf16.mxu1 %v902_v16  ;;  %v450_v55 = vsel %vm418_vm8, %v402_v45, %v434_v50  ;;  %468 = vst [vmem:[#allocation10 + $0x38] sm:$0xff] %v452_v53  ;;  %v711_v56 = vpack.c.bf16 %v452_v53, %v451_v48 }
 0x150   :  { %v308_v52 = vpop.f32.mrb[9].mxu0  ;;  %466 = vst [vmem:[#allocation10 + $0x28] sm:$0xff] %v450_v55  ;;  %v708_v58 = vpack.c.bf16 %v450_v55, %v449_v51  ;;  %v407_v59 = vadd.f32 %v660_v49, %v995_v19 }
 0x151   :  { %v661_v54 = vpop.f32.mrb[10].mxu0  ;;  %v405_v60 = vadd.f32 %v995_v19, %v308_v52 }
 0x152   :  { %v311_v57 = vpop.f32.mrb[11].mxu0  ;;  %709 = vmatpush3.bf16.msra.mxu1 %v708_v58  ;;  %v408_v61 = vadd.f32 %v661_v54, %v995_v19  ;;  %vm423_vm9 = vcmp.gt.f32.partialorder %v407_v59, 0.0  ;;  %v439_v62 = vmul.f32 0.25, %v407_v59 }
 0x153   :  { %710 = vmatprep.subr.bf16.mxu1 %v902_v16  ;;  %v406_v63 = vadd.f32 %v995_v19, %v311_v57  ;;  %vm421_vm10 = vcmp.gt.f32.partialorder %v405_v60, 0.0  ;;  %v437_v0 = vmul.f32 0.25, %v405_v60 }
 0x154   :  { %vm424_vm11 = vcmp.gt.f32.partialorder %v408_v61, 0.0  ;;  %v440_v1 = vmul.f32 0.25, %v408_v61  ;;  %v455_v2 = vsel %vm423_vm9, %v407_v59, %v439_v62 }
 0x155   :  { %vm422_vm12 = vcmp.gt.f32.partialorder %v406_v63, 0.0  ;;  %v438_v4 = vmul.f32 0.25, %v406_v63  ;;  %v453_v5 = vsel %vm421_vm10, %v405_v60, %v437_v0  ;;  %471 = vst [vmem:[#allocation10 + $0x50] sm:$0xff] %v455_v2 }
 0x156   :  { %712 = vmatpush3.bf16.msra.mxu1 %v711_v56  ;;  %469 = vst [vmem:[#allocation10 + $0x40] sm:$0xff] %v453_v5  ;;  %v456_v7 = vsel %vm424_vm11, %v408_v61, %v440_v1 }
 0x157   :  { %v664_v3 = vpop.f32.mrb[12].mxu0  ;;  %713 = vmatprep.subr.bf16.mxu1 %v902_v16  ;;  %v454_v9 = vsel %vm422_vm12, %v406_v63, %v438_v4  ;;  %472 = vst [vmem:[#allocation10 + $0x58] sm:$0xff] %v456_v7  ;;  %v717_v10 = vpack.c.bf16 %v456_v7, %v455_v2 }
 0x158   :  { %v324_v6 = vpop.f32.mrb[13].mxu0  ;;  %470 = vst [vmem:[#allocation10 + $0x48] sm:$0xff] %v454_v9  ;;  %v714_v12 = vpack.c.bf16 %v454_v9, %v453_v5  ;;  %v411_v13 = vadd.f32 %v664_v3, %v995_v19 }
 0x159   :  { %v665_v8 = vpop.f32.mrb[14].mxu0  ;;  %v409_v14 = vadd.f32 %v995_v19, %v324_v6 }
 0x15a   :  { %v327_v11 = vpop.f32.mrb[15].mxu0  ;;  %715 = vmatpush3.bf16.msra.mxu1 %v714_v12  ;;  %v412_v15 = vadd.f32 %v665_v8, %v995_v19  ;;  %vm427_vm13 = vcmp.gt.f32.partialorder %v411_v13, 0.0  ;;  %v443_v17 = vmul.f32 0.25, %v411_v13 }
 0x15b   :  { %716 = vmatprep.subr.bf16.mxu1 %v902_v16  ;;  %v410_v18 = vadd.f32 %v995_v19, %v327_v11  ;;  %vm425_vm14 = vcmp.gt.f32.partialorder %v409_v14, 0.0  ;;  %v441_v20 = vmul.f32 0.25, %v409_v14  ;;  %v477_v19 = vld [vmem:[#allocation8] sm:$0xff] }
 0x15c   :  { %vm428_vm15 = vcmp.gt.f32.partialorder %v412_v15, 0.0  ;;  %v444_v21 = vmul.f32 0.25, %v412_v15  ;;  %v459_v22 = vsel %vm427_vm13, %v411_v13, %v443_v17 }
 0x15d   :  { %vm426_vm0 = vcmp.gt.f32.partialorder %v410_v18, 0.0  ;;  %v442_v23 = vmul.f32 0.25, %v410_v18  ;;  %v457_v24 = vsel %vm425_vm14, %v409_v14, %v441_v20  ;;  %475 = vst [vmem:[#allocation10 + $0x70] sm:$0xff] %v459_v22 }
 0x15e   :  { %718 = vmatpush3.bf16.msra.mxu1 %v717_v10  ;;  %473 = vst [vmem:[#allocation10 + $0x60] sm:$0xff] %v457_v24  ;;  %v460_v25 = vsel %vm428_vm15, %v412_v15, %v444_v21 }
 0x15f   :  { %719 = vmatprep.subr.bf16.mxu1 %v902_v16  ;;  %v458_v26 = vsel %vm426_vm0, %v410_v18, %v442_v23  ;;  %476 = vst [vmem:[#allocation10 + $0x78] sm:$0xff] %v460_v25  ;;  %v723_v27 = vpack.c.bf16 %v460_v25, %v459_v22 }
 0x160   :  { %474 = vst [vmem:[#allocation10 + $0x68] sm:$0xff] %v458_v26  ;;  %v720_v28 = vpack.c.bf16 %v458_v26, %v457_v24 }
 0x162   :  { %721 = vmatpush3.bf16.msra.mxu1 %v720_v28 }
 0x163   :  { %722 = vmatprep.subr.bf16.mxu1 %v902_v16 }
 0x166   :  { %724 = vmatpush3.bf16.msra.mxu1 %v723_v27 }
 0x169   :  { %699 = vmatmul.mubr.f32.vlgmr.msra.gmra.mrb[0].mxu1 %v477_v19 }
 0x16a   :  { %853 = shalt.err (!%p850_p8)
}
 0x16b   :  { %s854_s19 = scalar_lea.hbm %s1048_s4, 2048 }
 0x16c   :  { %p855_p9 = scmp.ne.s32.totalorder %s1048_s4, %s854_s19  ;;  %p858_p10 = scmp.lt.u32.totalorder %s854_s19, %s1048_s4 }
 0x16e   :  { %p860_p11 = pnand %p858_p10, %p855_p9 }
 0x170   :  { %863 = shalt.err (!%p860_p11)
}
 0x171   :  { %s906_s25 = smov 128   ;;  %s907_s26 = smov 8  }
 0x172   :  { %560 = dma.vmem_to_hbm [thread:$0]  %s555_s16, 2048, %s1048_s4, [#allocation4], %s906_s25, %s906_s25, %s907_s26  }
 0x173   :  { %s908_s29 = smov [#allocation11]  }
 0x174   :  { %s567_s0 = sshll.u32 %s908_s29, 4  ;;  %s568_s0 = int_to_ptr.vmem [resolvable:$true] %s567_s0 }
 0x175   :  { %s864_s21 = scalar_lea.vmem %s568_s0, 128  ;;  %p869_p13 = scmp.lt.s32.totalorder %s568_s0, %s568_s0 }
 0x176   :  { %p865_p12 = scmp.ne.s32.totalorder %s568_s0, %s864_s21  ;;  %p870_p0 = scmp.lt.s32.totalorder %s864_s21, %s864_s21 }
 0x178   :  { %p871_p1 = por %p870_p0, %p869_p13 }
 0x17a   :  { %p872_p2 = pnand %p871_p1, %p865_p12 }
 0x23c   :  { %v544_v16 = vpop.f32.mrb[0].mxu1 }
 0x23d   :  { %548 = vst [vmem:[#allocation11] sm:$0xff] %v544_v16  ;;  %v700_v29 = vpop.f32.mrb[1].mxu1 }
 0x23e   :  { %875 = shalt.err (!%p872_p2)
}
 0x23f   :  { %s876_s7 = scalar_lea.hbm %s1049_s5, 128 }
 0x240   :  { %p877_p3 = scmp.ne.s32.totalorder %s1049_s5, %s876_s7  ;;  %p880_p4 = scmp.lt.u32.totalorder %s876_s7, %s1049_s5 }
 0x242   :  { %p882_p5 = pnand %p880_p4, %p877_p3 }
 0x244   :  { %885 = shalt.err (!%p882_p5)
}
 0x245   :  { %570 = dma.vmem_to_hbm [thread:$0]  %s568_s0, 128, %s1049_s5, [#allocation12]  }
 0x246   :  { %892 = dma.done.wait [#allocation4], 2048  }
 0x247   :  { %893 = vsyncadd [#allocation4], 4294965248 }
 0x248   :  { %894 = dma.done.wait [#allocation12], 128  }
 0x249   :  { %895 = vsyncadd [#allocation12], 4294967168 }
 0x24a   :  { %577 = vsyncpa [#allocation3], 1 }
 0x24b   :  { %578 = vsyncpa [#allocation6], 1 }
 0x24c   :  { %579 = vsyncpa [#allocation9], 1 }
 0x24d   :  { %580 = vsyncpa [#allocation4], 1 }
 0x24e   :  { %581 = vsyncpa [#allocation12], 1 }

</bundles_post_ra>
